<compile_context>
chip_gen: v7x
topology: tpu7x:2x2x1
jax: 0.10.0
libtpu: 0.0.40
codegen_flags: <defaults>
</compile_context>

<pallas_src>
import functools

import jax
import jax.numpy as jnp
from jax.experimental import pallas as pl
from jax.experimental.pallas import tpu as pltpu

MARGIN = 1.0


def _round_up(x, m):
    return ((x + m - 1) // m) * m


def _triplet_loss_kernel(a_ref, p_ref, n_ref, o_ref, *, block_b, batch, margin):
    i = pl.program_id(0)

    a = a_ref[...].astype(jnp.float32)
    p = p_ref[...].astype(jnp.float32)
    n = n_ref[...].astype(jnp.float32)

    dp = a - p
    dn = a - n
    # Fused single cross-lane reduction:
    #   sum((a-p)^2, axis=1) - sum((a-n)^2, axis=1) == sum((a-p)^2 - (a-n)^2)
    d = jnp.sum(dp * dp - dn * dn, axis=1, keepdims=True)   # (TB, 1)
    losses = jnp.maximum(d + margin, 0.0)

    # Ragged last tile: rows >= batch hold stale/undefined VMEM data; zero
    # them so they can never contribute (boundary writes are also clipped).
    row = i * block_b + jax.lax.broadcasted_iota(jnp.int32, (block_b, 1), 0)
    o_ref[...] = jnp.where(row < batch, losses, 0.0)


def triplet_loss(anchor, positive, negative, margin=MARGIN, block_b=None):
    B, D = anchor.shape

    # Tile sizing: 3 inputs x 2 pipeline buffers x TB x lane-padded D bytes
    # kept under ~12 MiB so the default scoped-VMEM limit never binds.
    itemsize = jnp.dtype(anchor.dtype).itemsize
    lane_d = _round_up(max(D, 1), 128)          # VMEM lane footprint per row
    if block_b is None:
        vmem_budget = 12 * 1024 * 1024
        max_tb = vmem_budget // (3 * 2 * lane_d * itemsize)
        tb = int(min(2048, max(8, (max_tb // 8) * 8)))
    else:
        tb = max(8, (int(block_b) // 8) * 8)

    if B < 8:
        tb = B                                   # block dim == full array dim
    else:
        tb = min(tb, _round_up(B, 8))

    grid = (pl.cdiv(B, tb),)
    in_spec = pl.BlockSpec((tb, D), lambda i: (i, 0))   # full feature extent

    per_row = pl.pallas_call(
        functools.partial(
            _triplet_loss_kernel, block_b=tb, batch=B, margin=float(margin)
        ),
        out_shape=jax.ShapeDtypeStruct((B, 1), jnp.float32),
        grid=grid,
        in_specs=[in_spec, in_spec, in_spec],
        out_specs=pl.BlockSpec((tb, 1), lambda i: (i, 0)),
        compiler_params=pltpu.CompilerParams(
            dimension_semantics=("parallel",),
        ),
    )(anchor, positive, negative)

    # Tiny finalize in plain JAX: mean over the true batch.
    return jnp.sum(per_row) / B


def triplet_loss_ref(anchor, positive, negative, margin=MARGIN):
    a = anchor.astype(jnp.float32)
    p = positive.astype(jnp.float32)
    n = negative.astype(jnp.float32)
    dp = jnp.sum((a - p) ** 2, axis=1)
    dn = jnp.sum((a - n) ** 2, axis=1)
    return jnp.mean(jnp.maximum(dp - dn + margin, 0.0))


if __name__ == "__main__":
    key = jax.random.PRNGKey(0)

    # Case 1: small embedding batch, tiny feature dim (single tile).
    B, D = 8, 32
    k_a, k_p, k_n, key = jax.random.split(key, 4)
    anchor = jax.random.normal(k_a, (B, D), dtype=jnp.float32)
    positive = jax.random.normal(k_p, (B, D), dtype=jnp.float32)
    negative = jax.random.normal(k_n, (B, D), dtype=jnp.float32)

    out = jax.block_until_ready(triplet_loss(anchor, positive, negative))
    ref = jax.block_until_ready(triplet_loss_ref(anchor, positive, negative))
    assert jnp.allclose(out, ref, rtol=1e-5, atol=1e-5), (out, ref)

    # Case 2: ragged batch + non-128 feature dim + forced multi-tile grid,
    # exercising the boundary-block mask and the parallel grid axis.
    B2, D2 = 37, 40
    k_a, k_p, k_n, key = jax.random.split(key, 4)
    anchor2 = jax.random.normal(k_a, (B2, D2), dtype=jnp.float32)
    positive2 = jax.random.normal(k_p, (B2, D2), dtype=jnp.float32)
    negative2 = jax.random.normal(k_n, (B2, D2), dtype=jnp.float32)

    out2 = jax.block_until_ready(
        triplet_loss(anchor2, positive2, negative2, block_b=16)
    )
    ref2 = jax.block_until_ready(triplet_loss_ref(anchor2, positive2, negative2))
    assert jnp.allclose(out2, ref2, rtol=1e-5, atol=1e-5), (out2, ref2)

    # Case 3: bf16 inputs stream at half the HBM bytes, upcast in-kernel.
    B3, D3 = 24, 128
    k_a, k_p, k_n, key = jax.random.split(key, 4)
    anchor3 = jax.random.normal(k_a, (B3, D3), dtype=jnp.bfloat16)
    positive3 = jax.random.normal(k_p, (B3, D3), dtype=jnp.bfloat16)
    negative3 = jax.random.normal(k_n, (B3, D3), dtype=jnp.bfloat16)

    out3 = jax.block_until_ready(triplet_loss(anchor3, positive3, negative3))
    ref3 = jax.block_until_ready(triplet_loss_ref(anchor3, positive3, negative3))
    assert jnp.allclose(out3, ref3, rtol=1e-2, atol=1e-2), (out3, ref3)

    print("KERNEL_OK")
</pallas_src>

<mosaic_0001>
module attributes {stable_mosaic.version = 11 : i64} {
  func.func @_triplet_loss_kernel(%arg0: i32, %arg1: memref<8x32xf32, #tpu.memory_space<vmem>>, %arg2: memref<8x32xf32, #tpu.memory_space<vmem>>, %arg3: memref<8x32xf32, #tpu.memory_space<vmem>>, %arg4: memref<8x1xf32, #tpu.memory_space<vmem>>) attributes {dimension_semantics = [#tpu.dimension_semantics<parallel>], iteration_bounds = array<i64: 1>, scalar_prefetch = 0 : i64, scratch_operands = 0 : i64, tpu.core_type = #tpu.core_type<tc>, window_params = [{transform_indices = @transform_0, window_bounds = array<i64: 8, 32>}, {transform_indices = @transform_1, window_bounds = array<i64: 8, 32>}, {transform_indices = @transform_2, window_bounds = array<i64: 8, 32>}, {transform_indices = @transform_3, window_bounds = array<i64: 8, 1>}]} {
    %c0 = arith.constant 0 : index
    %c0_0 = arith.constant 0 : index
    %0 = vector.load %arg1[%c0, %c0_0] : memref<8x32xf32, #tpu.memory_space<vmem>>, vector<8x32xf32>
    %c0_1 = arith.constant 0 : index
    %c0_2 = arith.constant 0 : index
    %1 = vector.load %arg2[%c0_1, %c0_2] : memref<8x32xf32, #tpu.memory_space<vmem>>, vector<8x32xf32>
    %c0_3 = arith.constant 0 : index
    %c0_4 = arith.constant 0 : index
    %2 = vector.load %arg3[%c0_3, %c0_4] : memref<8x32xf32, #tpu.memory_space<vmem>>, vector<8x32xf32>
    %3 = arith.subf %0, %1 : vector<8x32xf32>
    %4 = arith.subf %0, %2 : vector<8x32xf32>
    %5 = arith.mulf %3, %3 : vector<8x32xf32>
    %6 = arith.mulf %4, %4 : vector<8x32xf32>
    %7 = arith.subf %5, %6 : vector<8x32xf32>
    %cst = arith.constant dense<0.000000e+00> : vector<8xf32>
    %8 = vector.multi_reduction <add>, %7, %cst [1] : vector<8x32xf32> to vector<8xf32>
    %9 = vector.shape_cast %8 : vector<8xf32> to vector<8x1xf32>
    %cst_5 = arith.constant 1.000000e+00 : f32
    %10 = vector.broadcast %cst_5 : f32 to vector<8x1xf32>
    %11 = arith.addf %9, %10 : vector<8x1xf32>
    %cst_6 = arith.constant 0.000000e+00 : f32
    %12 = vector.broadcast %cst_6 : f32 to vector<8x1xf32>
    %13 = arith.maximumf %11, %12 : vector<8x1xf32>
    %c8_i32 = arith.constant 8 : i32
    %14 = arith.muli %arg0, %c8_i32 : i32
    %15 = tpu.iota {dimensions = array<i32: 0>} : vector<8x1xi32>
    %16 = vector.broadcast %14 : i32 to vector<8x1xi32>
    %17 = arith.addi %16, %15 : vector<8x1xi32>
    %c8_i32_7 = arith.constant 8 : i32
    %18 = vector.broadcast %c8_i32_7 : i32 to vector<8x1xi32>
    %19 = arith.cmpi slt, %17, %18 : vector<8x1xi32>
    %cst_8 = arith.constant 0.000000e+00 : f32
    %20 = vector.broadcast %cst_8 : f32 to vector<8x1xf32>
    %21 = arith.select %19, %13, %20 : vector<8x1xi1>, vector<8x1xf32>
    %c0_9 = arith.constant 0 : index
    %c0_10 = arith.constant 0 : index
    %22 = vector.load %arg4[%c0_9, %c0_10] : memref<8x1xf32, #tpu.memory_space<vmem>>, vector<8x1xf32>
    tpu.vector_store %arg4[%c0_9, %c0_10], %21 {strides = array<i32>} : memref<8x1xf32, #tpu.memory_space<vmem>>, vector<8x1xf32>,
    return
  }
  func.func @transform_0(%arg0: i32) -> (i32, i32) {
    %c0_i32 = arith.constant 0 : i32
    %c0_i32_0 = arith.constant 0 : i32
    return %arg0, %c0_i32 : i32, i32
  }
  func.func @transform_1(%arg0: i32) -> (i32, i32) {
    %c0_i32 = arith.constant 0 : i32
    %c0_i32_0 = arith.constant 0 : i32
    return %arg0, %c0_i32 : i32, i32
  }
  func.func @transform_2(%arg0: i32) -> (i32, i32) {
    %c0_i32 = arith.constant 0 : i32
    %c0_i32_0 = arith.constant 0 : i32
    return %arg0, %c0_i32 : i32, i32
  }
  func.func @transform_3(%arg0: i32) -> (i32, i32) {
    %c0_i32 = arith.constant 0 : i32
    %c0_i32_0 = arith.constant 0 : i32
    return %arg0, %c0_i32 : i32, i32
  }
}

</mosaic_0001>

<bundles_post_ra>
// kernel: tpu_custom_call.1
= control target key start
LH: loop header
LB: loop body
LE: loop exit
PB: predicated region body
PF: predicated region fallthrough
CT: control target
= control target key end

     0   :  { %8 = vsyncpa [#allocation3], 0  ;;  %s213_s0 = inlined_call_operand.hbm [shape: f32[8,32], index: 0, kind: input, shape index: {}]   ;;  %s214_s1 = inlined_call_operand.hbm [shape: f32[8,32], index: 1, kind: input, shape index: {}]   ;;  %s215_s2 = inlined_call_operand.hbm [shape: f32[8,32], index: 2, kind: input, shape index: {}]   ;;  %s216_s3 = inlined_call_operand.vmem [shape: f32[8,1], index: 3, kind: output, shape index: {}]  }
   0x1   :  { %9 = vsyncpa [#allocation5], 0  ;;  %s151_s12 = smov [#allocation4]   ;;  %s152_s14 = smov [#allocation2]  }
   0x2   :  { %s26_s13 = sshll.u32 %s151_s12, 4  ;;  %s16_s15 = sshll.u32 %s152_s14, 4  ;;  %s27_s13 = int_to_ptr.vmem [resolvable:$true] %s26_s13  ;;  %s17_s15 = int_to_ptr.vmem [resolvable:$true] %s16_s15 }
   0x3   :  { %s81_s18 = scalar_lea.hbm %s214_s1, 128 }
   0x4   :  { %p82_p0 = scmp.ne.s32.totalorder %s214_s1, %s81_s18  ;;  %p85_p1 = scmp.lt.u32.totalorder %s81_s18, %s214_s1 }
   0x6   :  { %p87_p2 = pnand %p85_p1, %p82_p0 }
   0x8   :  { %90 = shalt.err (!%p87_p2)
}
   0x9   :  { %s91_s23 = scalar_lea.vmem %s27_s13, 128  ;;  %p96_p4 = scmp.lt.s32.totalorder %s27_s13, %s27_s13 }
   0xa   :  { %p92_p3 = scmp.ne.s32.totalorder %s27_s13, %s91_s23  ;;  %p97_p5 = scmp.lt.s32.totalorder %s91_s23, %s91_s23 }
   0xc   :  { %p98_p6 = por %p97_p5, %p96_p4 }
   0xe   :  { %p99_p7 = pnand %p98_p6, %p92_p3 }
  0x10   :  { %102 = shalt.err (!%p99_p7)
}
  0x11   :  { %29 = dma.hbm_to_vmem [thread:$0]  %s214_s1, 128, %s27_s13, [#allocation5]  }
  0x12   :  { %s103_s28 = scalar_lea.hbm %s213_s0, 128 }
  0x13   :  { %p104_p8 = scmp.ne.s32.totalorder %s213_s0, %s103_s28  ;;  %p107_p9 = scmp.lt.u32.totalorder %s103_s28, %s213_s0 }
  0x15   :  { %p109_p10 = pnand %p107_p9, %p104_p8 }
  0x17   :  { %112 = shalt.err (!%p109_p10)
}
  0x18   :  { %s113_s6 = scalar_lea.vmem %s17_s15, 128  ;;  %p118_p12 = scmp.lt.s32.totalorder %s17_s15, %s17_s15 }
  0x19   :  { %p114_p11 = scmp.ne.s32.totalorder %s17_s15, %s113_s6  ;;  %p119_p13 = scmp.lt.s32.totalorder %s113_s6, %s113_s6 }
  0x1b   :  { %p120_p0 = por %p119_p13, %p118_p12 }
  0x1d   :  { %p121_p1 = pnand %p120_p0, %p114_p11 }
  0x1f   :  { %124 = shalt.err (!%p121_p1)
}
  0x20   :  { %19 = dma.hbm_to_vmem [thread:$0]  %s213_s0, 128, %s17_s15, [#allocation3]  }
  0x21   :  { %s153_s8 = smov [#allocation6]   ;;  %s125_s12 = scalar_lea.hbm %s215_s2, 128 }
  0x22   :  { %s36_s9 = sshll.u32 %s153_s8, 4  ;;  %p126_p2 = scmp.ne.s32.totalorder %s215_s2, %s125_s12  ;;  %s37_s9 = int_to_ptr.vmem [resolvable:$true] %s36_s9 }
  0x23   :  { %p129_p3 = scmp.lt.u32.totalorder %s125_s12, %s215_s2 }
  0x25   :  { %p131_p4 = pnand %p129_p3, %p126_p2 }
  0x27   :  { %134 = shalt.err (!%p131_p4)
}
  0x28   :  { %s135_s18 = scalar_lea.vmem %s37_s9, 128  ;;  %p140_p6 = scmp.lt.s32.totalorder %s37_s9, %s37_s9 }
  0x29   :  { %p136_p5 = scmp.ne.s32.totalorder %s37_s9, %s135_s18  ;;  %p141_p7 = scmp.lt.s32.totalorder %s135_s18, %s135_s18 }
  0x2b   :  { %p142_p8 = por %p141_p7, %p140_p6 }
  0x2d   :  { %p143_p9 = pnand %p142_p8, %p136_p5 }
  0x2f   :  { %146 = shalt.err (!%p143_p9)
}
  0x30   :  { %39 = dma.hbm_to_vmem [thread:$0]  %s215_s2, 128, %s37_s9, [#allocation5]  }
  0x31   :  { %147 = dma.done.wait [#allocation3], 128  }
  0x32   :  { %148 = vsyncadd [#allocation3], 4294967168 }
  0x33   :  { %149 = dma.done.wait [#allocation5], 256  }
  0x34   :  { %150 = vsyncadd [#allocation5], 4294967040  ;;  %v49_v0 = vld [vmem:[#allocation2] sm:$0xff]  ;;  %v50_v1 = vld [vmem:[#allocation4] sm:$0xff]  ;;  %vm57_vm0 = vcmask 261120   ;;  %vm70_vm1 = vcmask 7168  }
  0x35   :  { %v51_v2 = vld [vmem:[#allocation6] sm:$0xff]  ;;  %v52_v3 = vsub.f32 %v49_v0, %v50_v1 }
  0x36   :  { %v53_v4 = vsub.f32 %v49_v0, %v51_v2 }
  0x37   :  { %v54_v5 = vmul.f32 %v52_v3, %v52_v3 }
  0x38   :  { %v55_v6 = vmul.f32 %v53_v4, %v53_v4 }
  0x3a   :  { %v56_v7 = vsub.f32 %v54_v5, %v55_v6 }
  0x3c   :  { %v58_v8 = vsel %vm57_vm0, %v56_v7, 0.0 }
  0x3d   :  { %59 = vadd.xlane.f32.xlu0 %v58_v8 }
  0xca   :  { %v60_v9 = vpop.xlane.xlu0 %59 }
  0xcb   :  { %v61_v10 = vadd.f32 1.0, %v60_v9 }
  0xcd   :  { %v62_v11 = vmax.f32 %v61_v10, 0.0 }
  0xcf   :  { %71 = vst.msk [vmem:[%s216_s3] sm:$0xff] %vm70_vm1, %v62_v11 }
  0xd0   :  { %76 = vsyncpa [#allocation3], 1 }
  0xd1   :  { %77 = vsyncpa [#allocation5], 1 }

</bundles_post_ra>
